<compile_context>
chip_gen: v7x
topology: tpu7x:2x2x1
jax: 0.10.0
libtpu: 0.0.40
codegen_flags: <defaults>
</compile_context>

<pallas_src>
import functools

import jax
import jax.numpy as jnp
from jax.experimental import pallas as pl
from jax.experimental.pallas import tpu as pltpu


def _round_up(x, m):
    return ((x + m - 1) // m) * m


def _pad2d(a, rows, cols):
    pr, pc = rows - a.shape[0], cols - a.shape[1]
    if pr or pc:
        a = jnp.pad(a, ((0, pr), (0, pc)))
    return a


def _vmem_budget_bytes(vmem_limit_mb):
    if vmem_limit_mb is not None:
        return vmem_limit_mb << 20
    try:
        cap = int(getattr(pltpu.get_tpu_info(), "vmem_capacity_bytes", 64 << 20))
    except Exception:
        cap = 64 << 20
    # ~75% of physical VMEM: ~96 MiB on v5e/v6e (128 MiB), ~48 MiB on v7x (64 MiB/TC).
    return min((cap * 3) // 4, 100 << 20)


# ---------------------------------------------------------------------------
# Kernels
# ---------------------------------------------------------------------------
def _ffn_resident_kernel(x_ref, w1_ref, b1_ref, w2_ref, b2_ref, o_ref):
    """Fast path: W1/W2/b1/b2 fully resident in VMEM; grid = (row tiles,)."""
    h = jnp.dot(x_ref[...], w1_ref[...], preferred_element_type=jnp.float32)
    h = jnp.maximum(h + b1_ref[...].astype(jnp.float32), 0.0)
    # Dropout in eval/inference mode is the identity.
    out = jnp.dot(h.astype(w2_ref.dtype), w2_ref[...],
                  preferred_element_type=jnp.float32)
    o_ref[...] = (out + b2_ref[...].astype(jnp.float32)).astype(o_ref.dtype)


def _ffn_tiled_kernel(x_ref, w1_ref, b1_ref, w2_ref, b2_ref, o_ref, acc_ref):
    """Tiled path: grid = (row tiles, d_ff tiles); d_ff is the (last) reduction
    axis. acc_ref is an f32 (tm, d_model_p) accumulator resident across it."""
    j = pl.program_id(1)

    @pl.when(j == 0)
    def _init():
        # Seed the accumulator with the second bias (added exactly once).
        acc_ref[...] = jnp.broadcast_to(
            b2_ref[...].astype(jnp.float32), acc_ref.shape)

    # h_j = relu(x @ W1[:, j] + b1[j])  -- f32 accumulation on the MXU.
    h = jnp.dot(x_ref[...], w1_ref[...], preferred_element_type=jnp.float32)
    b1_j = b1_ref[pl.ds(j, 1), :]              # resident bias, sliced per step
    h = jnp.maximum(h + b1_j.astype(jnp.float32), 0.0)
    # Dropout in eval/inference mode is the identity.

    # acc += h_j @ W2[j, :]
    acc_ref[...] += jnp.dot(h.astype(w2_ref.dtype), w2_ref[...],
                            preferred_element_type=jnp.float32)

    @pl.when(j == pl.num_programs(1) - 1)
    def _finalize():
        o_ref[...] = acc_ref[...].astype(o_ref.dtype)


# ---------------------------------------------------------------------------
# Wrapper
# ---------------------------------------------------------------------------
@functools.partial(jax.jit, static_argnames=("tm", "tf", "vmem_limit_mb",
                                             "use_bf16_matmul", "force_tiled"))
def feed_forward(x, w1, b1, w2, b2, *, tm=512, tf=512, vmem_limit_mb=None,
                 use_bf16_matmul=False, force_tiled=False):
    """relu(x @ W1 + b1) @ W2 + b2, with x: (B, S, d_model)."""
    orig_dtype = x.dtype
    B, S, d_model = x.shape
    d_ff = w1.shape[1]
    M = B * S

    if use_bf16_matmul and x.dtype == jnp.float32:
        # bf16 MXU path (f32 accumulation kept via preferred_element_type).
        x = x.astype(jnp.bfloat16)
        w1 = w1.astype(jnp.bfloat16)
        w2 = w2.astype(jnp.bfloat16)

    x_bytes = x.dtype.itemsize
    w_bytes = w1.dtype.itemsize
    pack = 8 * max(1, 4 // x_bytes)          # sublane packing: f32=8, bf16=16, int8=32

    d_model_p = _round_up(d_model, 256)      # 256-wide MXU fill on v6e/v7x
    d_ff_p = _round_up(d_ff, 256)

    budget = _vmem_budget_bytes(vmem_limit_mb)
    avail = budget - (2 << 20)               # headroom for Mosaic internal scratch

    # Row tile: big for arithmetic intensity, but capped at ceil(M/2) so the
    # "parallel" row axis has >=2 tiles (both v7x TensorCores get work).
    tm_eff = min(tm, _round_up(M, pack))
    if _round_up(M, pack) >= 2 * pack:
        tm_eff = min(tm_eff, _round_up((M + 1) // 2, pack))
    tm_eff = max(pack, _round_up(tm_eff, pack))

    # ---- fast-path feasibility: full weights resident in VMEM ---------------
    def _resident_bytes(tm_c):
        return (4 * tm_c * d_model_p * x_bytes          # x + out tiles (double-buffered)
                + 4 * d_model_p * d_ff_p * w_bytes      # W1 + W2 (buffer pair each)
                + 2 * (d_ff_p + d_model_p) * w_bytes    # b1 + b2
                + tm_c * d_ff_p * 4)                    # materialized f32 h tile

    tm_fast = tm_eff
    use_fast = (not force_tiled) and _resident_bytes(tm_fast) <= avail
    while (not force_tiled) and (not use_fast) and tm_fast > 256:
        tm_fast = max(256, _round_up(tm_fast // 2, pack))
        use_fast = _resident_bytes(tm_fast) <= avail

    if use_fast:
        # ---------------- fast path: weights DMA'd once ----------------------
        tm_eff = tm_fast
        Mp = _round_up(M, tm_eff)
        n_row = Mp // tm_eff

        x2d = _pad2d(x.reshape(M, d_model), Mp, d_model_p)
        w1p = _pad2d(w1, d_model_p, d_ff_p)
        b1p = _pad2d(b1.reshape(1, d_ff), 1, d_ff_p)
        w2p = _pad2d(w2, d_ff_p, d_model_p)
        b2p = _pad2d(b2.reshape(1, d_model), 1, d_model_p)

        cost = pl.CostEstimate(
            flops=2 * 2 * Mp * d_model_p * d_ff_p,
            transcendentals=0,
            bytes_accessed=(Mp * d_model_p * (x_bytes + orig_dtype.itemsize)
                            + (w1p.size + w2p.size + b1p.size + b2p.size) * w_bytes))

        out2d = pl.pallas_call(
            _ffn_resident_kernel,
            out_shape=jax.ShapeDtypeStruct((Mp, d_model_p), orig_dtype),
            grid_spec=pltpu.PrefetchScalarGridSpec(
                num_scalar_prefetch=0,
                grid=(n_row,),
                in_specs=[
                    pl.BlockSpec((tm_eff, d_model_p), lambda i: (i, 0)),   # x
                    pl.BlockSpec((d_model_p, d_ff_p), lambda i: (0, 0)),   # W1 (resident)
                    pl.BlockSpec((1, d_ff_p),         lambda i: (0, 0)),   # b1 (resident)
                    pl.BlockSpec((d_ff_p, d_model_p), lambda i: (0, 0)),   # W2 (resident)
                    pl.BlockSpec((1, d_model_p),      lambda i: (0, 0)),   # b2 (resident)
                ],
                out_specs=pl.BlockSpec((tm_eff, d_model_p), lambda i: (i, 0)),
            ),
            compiler_params=pltpu.CompilerParams(
                dimension_semantics=("parallel",),
                vmem_limit_bytes=budget),
            cost_estimate=cost,
        )(x2d, w1p, b1p, w2p, b2p)

    else:
        # ---------------- tiled path: stream W1/W2 along d_ff ----------------
        tf_eff = max(256, _round_up(min(tf, d_ff_p), 256))
        tf_eff = min(tf_eff, d_ff_p)

        def _tiled_bytes(tm_c, tf_c):
            return (4 * tm_c * d_model_p * x_bytes        # x + out (double-buffered)
                    + 4 * tf_c * d_model_p * w_bytes      # W1 + W2 tiles (double-buffered)
                    + 2 * (d_ff_p + d_model_p) * w_bytes  # b1 (resident) + b2
                    + tm_c * d_model_p * 4                # f32 accumulator
                    + tm_c * tf_c * 4)                    # materialized f32 h tile

        # Prefer shrinking tf before tm: tm sets FLOP/byte of the weight stream.
        while _tiled_bytes(tm_eff, tf_eff) > avail:
            if tf_eff > 256:
                tf_eff //= 2
            elif tm_eff > max(pack, 128):
                tm_eff = max(pack, _round_up(tm_eff // 2, pack))
            else:
                break

        Mp = _round_up(M, tm_eff)
        d_ff_pp = _round_up(d_ff_p, tf_eff)
        n_row = Mp // tm_eff
        n_ff = d_ff_pp // tf_eff

        x2d = _pad2d(x.reshape(M, d_model), Mp, d_model_p)
        w1p = _pad2d(w1, d_model_p, d_ff_pp)
        b1p = _pad2d(b1.reshape(1, d_ff), 1, d_ff_pp).reshape(n_ff, tf_eff)
        w2p = _pad2d(w2, d_ff_pp, d_model_p)
        b2p = _pad2d(b2.reshape(1, d_model), 1, d_model_p)

        cost = pl.CostEstimate(
            flops=2 * 2 * Mp * d_model_p * d_ff_pp,
            transcendentals=0,
            bytes_accessed=(Mp * d_model_p * (x_bytes + orig_dtype.itemsize)
                            + n_row * (w1p.size + w2p.size) * w_bytes
                            + (b1p.size + b2p.size) * w_bytes))

        out2d = pl.pallas_call(
            _ffn_tiled_kernel,
            out_shape=jax.ShapeDtypeStruct((Mp, d_model_p), orig_dtype),
            grid_spec=pltpu.PrefetchScalarGridSpec(
                num_scalar_prefetch=0,
                grid=(n_row, n_ff),                                       # reduction last
                in_specs=[
                    pl.BlockSpec((tm_eff, d_model_p), lambda i, j: (i, 0)),  # x
                    pl.BlockSpec((d_model_p, tf_eff), lambda i, j: (0, j)),  # W1 tile
                    pl.BlockSpec((n_ff, tf_eff),      lambda i, j: (0, 0)),  # b1 (resident)
                    pl.BlockSpec((tf_eff, d_model_p), lambda i, j: (j, 0)),  # W2 tile
                    pl.BlockSpec((1, d_model_p),      lambda i, j: (0, 0)),  # b2 (resident)
                ],
                out_specs=pl.BlockSpec((tm_eff, d_model_p), lambda i, j: (i, 0)),
                scratch_shapes=[pltpu.VMEM((tm_eff, d_model_p), jnp.float32)],
            ),
            compiler_params=pltpu.CompilerParams(
                dimension_semantics=("parallel", "arbitrary"),
                vmem_limit_bytes=budget),
            cost_estimate=cost,
        )(x2d, w1p, b1p, w2p, b2p)

    if Mp != M or d_model_p != d_model:
        out2d = out2d[:M, :d_model]
    return out2d.reshape(B, S, d_model)


# ---------------------------------------------------------------------------
# Params / reference / tests
# ---------------------------------------------------------------------------
def init_params(key, d_model, d_ff, dtype=jnp.float32):
    """Deterministic init mirroring nn.Linear's uniform(-1/sqrt(fan_in), ...)."""
    k1, k2, k3, k4 = jax.random.split(key, 4)
    lim1 = 1.0 / (d_model ** 0.5)
    lim2 = 1.0 / (d_ff ** 0.5)
    # stored as (in, out) so the kernel does x @ W
    w1 = jax.random.uniform(k1, (d_model, d_ff), dtype, -lim1, lim1)
    b1 = jax.random.uniform(k2, (d_ff,), dtype, -lim1, lim1)
    w2 = jax.random.uniform(k3, (d_ff, d_model), dtype, -lim2, lim2)
    b2 = jax.random.uniform(k4, (d_model,), dtype, -lim2, lim2)
    return w1, b1, w2, b2


def _ref(x, w1, b1, w2, b2):
    return jnp.maximum(x @ w1 + b1, 0.0) @ w2 + b2


if __name__ == "__main__":
    key = jax.random.PRNGKey(0)

    # ---- test 1: small f32 shapes (weights-resident fast path) --------------
    B, S, d_model, d_ff = 2, 8, 32, 64
    kx, kp, kx2, kp2 = jax.random.split(key, 4)
    x = jax.random.normal(kx, (B, S, d_model), jnp.float32)
    w1, b1, w2, b2 = init_params(kp, d_model, d_ff)
    out = feed_forward(x, w1, b1, w2, b2)
    jax.block_until_ready(out)
    assert out.shape == (B, S, d_model)
    assert jnp.allclose(out, _ref(x, w1, b1, w2, b2), atol=1e-5, rtol=1e-5)

    # ---- test 2: f32 tiled path (row tiling + d_ff accumulation + padding) --
    B2, S2, dm2, dff2 = 2, 24, 160, 384
    x2 = jax.random.normal(kx2, (B2, S2, dm2), jnp.float32)
    p2 = init_params(kp2, dm2, dff2)
    out2 = feed_forward(x2, *p2, tm=16, tf=256, force_tiled=True)
    jax.block_until_ready(out2)
    assert out2.shape == (B2, S2, dm2)
    assert jnp.allclose(out2, _ref(x2, *p2), atol=1e-4, rtol=1e-4)

    # ---- test 3: bf16 path (f32 MXU accumulation), loose tolerance ----------
    xb = x.astype(jnp.bfloat16)
    pb = tuple(p.astype(jnp.bfloat16) for p in (w1, b1, w2, b2))
    outb = feed_forward(xb, *pb)
    jax.block_until_ready(outb)
    assert outb.shape == (B, S, d_model)
    assert jnp.allclose(outb.astype(jnp.float32), _ref(x, w1, b1, w2, b2),
                        atol=1e-1, rtol=1e-1)

    # ---- test 4: f32 inputs with bf16 MXU flag (mixed precision) ------------
    outm = feed_forward(x, w1, b1, w2, b2, use_bf16_matmul=True)
    jax.block_until_ready(outm)
    assert outm.shape == (B, S, d_model)
    assert jnp.allclose(outm, _ref(x, w1, b1, w2, b2), atol=1e-1, rtol=1e-1)

    print("KERNEL_OK")
</pallas_src>

<mosaic_0001>
module attributes {stable_mosaic.version = 11 : i64} {
  func.func @_ffn_resident_kernel(%arg0: i32, %arg1: memref<8x256xf32, #tpu.memory_space<vmem>>, %arg2: memref<256x256xf32, #tpu.memory_space<vmem>>, %arg3: memref<1x256xf32, #tpu.memory_space<vmem>>, %arg4: memref<256x256xf32, #tpu.memory_space<vmem>>, %arg5: memref<1x256xf32, #tpu.memory_space<vmem>>, %arg6: memref<8x256xf32, #tpu.memory_space<vmem>>) attributes {dimension_semantics = [#tpu.dimension_semantics<parallel>], iteration_bounds = array<i64: 2>, scalar_prefetch = 0 : i64, scratch_operands = 0 : i64, tpu.core_type = #tpu.core_type<tc>, window_params = [{transform_indices = @transform_0, window_bounds = array<i64: 8, 256>}, {pipeline_mode = #tpu.pipeline_mode<synchronous>, transform_indices = @transform_1, window_bounds = array<i64: 256, 256>}, {pipeline_mode = #tpu.pipeline_mode<synchronous>, transform_indices = @transform_2, window_bounds = array<i64: 1, 256>}, {pipeline_mode = #tpu.pipeline_mode<synchronous>, transform_indices = @transform_3, window_bounds = array<i64: 256, 256>}, {pipeline_mode = #tpu.pipeline_mode<synchronous>, transform_indices = @transform_4, window_bounds = array<i64: 1, 256>}, {transform_indices = @transform_5, window_bounds = array<i64: 8, 256>}]} {
    %c0 = arith.constant 0 : index
    %c0_0 = arith.constant 0 : index
    %0 = vector.load %arg1[%c0, %c0_0] : memref<8x256xf32, #tpu.memory_space<vmem>>, vector<8x256xf32>
    %c0_1 = arith.constant 0 : index
    %c0_2 = arith.constant 0 : index
    %1 = vector.load %arg2[%c0_1, %c0_2] : memref<256x256xf32, #tpu.memory_space<vmem>>, vector<256x256xf32>
    %cst = arith.constant dense<0.000000e+00> : vector<8x256xf32>
    %2 = tpu.matmul %0, %1, %cst {dimension_numbers = #tpu.dot_dimension_numbers<[1], [0], [0], [1], [0, 0, 1, 1], [], []>} : vector<8x256xf32>, vector<256x256xf32>, vector<8x256xf32> -> vector<8x256xf32>
    %c0_3 = arith.constant 0 : index
    %c0_4 = arith.constant 0 : index
    %3 = vector.load %arg3[%c0_3, %c0_4] : memref<1x256xf32, #tpu.memory_space<vmem>>, vector<1x256xf32>
    %4 = vector.broadcast %3 : vector<1x256xf32> to vector<8x256xf32>
    %5 = arith.addf %2, %4 : vector<8x256xf32>
    %cst_5 = arith.constant 0.000000e+00 : f32
    %6 = vector.broadcast %cst_5 : f32 to vector<8x256xf32>
    %7 = arith.maximumf %5, %6 : vector<8x256xf32>
    %c0_6 = arith.constant 0 : index
    %c0_7 = arith.constant 0 : index
    %8 = vector.load %arg4[%c0_6, %c0_7] : memref<256x256xf32, #tpu.memory_space<vmem>>, vector<256x256xf32>
    %cst_8 = arith.constant dense<0.000000e+00> : vector<8x256xf32>
    %9 = tpu.matmul %7, %8, %cst_8 {dimension_numbers = #tpu.dot_dimension_numbers<[1], [0], [0], [1], [0, 0, 1, 1], [], []>} : vector<8x256xf32>, vector<256x256xf32>, vector<8x256xf32> -> vector<8x256xf32>
    %c0_9 = arith.constant 0 : index
    %c0_10 = arith.constant 0 : index
    %10 = vector.load %arg5[%c0_9, %c0_10] : memref<1x256xf32, #tpu.memory_space<vmem>>, vector<1x256xf32>
    %11 = vector.broadcast %10 : vector<1x256xf32> to vector<8x256xf32>
    %12 = arith.addf %9, %11 : vector<8x256xf32>
    %c0_11 = arith.constant 0 : index
    %c0_12 = arith.constant 0 : index
    %13 = vector.load %arg6[%c0_11, %c0_12] : memref<8x256xf32, #tpu.memory_space<vmem>>, vector<8x256xf32>
    tpu.vector_store %arg6[%c0_11, %c0_12], %12 {strides = array<i32>} : memref<8x256xf32, #tpu.memory_space<vmem>>, vector<8x256xf32>,
    return
  }
  func.func @transform_0(%arg0: i32) -> (i32, i32) {
    %c0_i32 = arith.constant 0 : i32
    %c0_i32_0 = arith.constant 0 : i32
    return %arg0, %c0_i32 : i32, i32
  }
  func.func @transform_1(%arg0: i32) -> (i32, i32) {
    %c0_i32 = arith.constant 0 : i32
    %c0_i32_0 = arith.constant 0 : i32
    %c0_i32_1 = arith.constant 0 : i32
    return %c0_i32, %c0_i32_0 : i32, i32
  }
  func.func @transform_2(%arg0: i32) -> (i32, i32) {
    %c0_i32 = arith.constant 0 : i32
    %c0_i32_0 = arith.constant 0 : i32
    %c0_i32_1 = arith.constant 0 : i32
    return %c0_i32, %c0_i32_0 : i32, i32
  }
  func.func @transform_3(%arg0: i32) -> (i32, i32) {
    %c0_i32 = arith.constant 0 : i32
    %c0_i32_0 = arith.constant 0 : i32
    %c0_i32_1 = arith.constant 0 : i32
    return %c0_i32, %c0_i32_0 : i32, i32
  }
  func.func @transform_4(%arg0: i32) -> (i32, i32) {
    %c0_i32 = arith.constant 0 : i32
    %c0_i32_0 = arith.constant 0 : i32
    %c0_i32_1 = arith.constant 0 : i32
    return %c0_i32, %c0_i32_0 : i32, i32
  }
  func.func @transform_5(%arg0: i32) -> (i32, i32) {
    %c0_i32 = arith.constant 0 : i32
    %c0_i32_0 = arith.constant 0 : i32
    return %arg0, %c0_i32 : i32, i32
  }
}

</mosaic_0001>

<bundles_post_ra>
// kernel: feed_forward.1
= control target key start
LH: loop header
LB: loop body
LE: loop exit
PB: predicated region body
PF: predicated region fallthrough
CT: control target
= control target key end

     0   :  { %s767_s18 = smov 0   ;;  %s1189_s0 = inlined_call_operand.vmem [shape: f32[16,256], index: 0, kind: input, shape index: {}]   ;;  %s1190_s1 = inlined_call_operand.vmem [shape: f32[256,256], index: 1, kind: input, shape index: {}]   ;;  %s1191_s2 = inlined_call_operand.vmem [shape: f32[1,256], index: 2, kind: input, shape index: {}]   ;;  %s1192_s3 = inlined_call_operand.vmem [shape: f32[256,256], index: 3, kind: input, shape index: {}]   ;;  %s1193_s4 = inlined_call_operand.vmem [shape: f32[1,256], index: 4, kind: input, shape index: {}]   ;;  %s1194_s5 = inlined_call_operand.vmem [shape: f32[16,256], index: 5, kind: output, shape index: {}]  }
   0x1 LB: > { %s580_s19 = sadd.s32 4294967295, %s735_s18   ;;  %p584_p0 = scmp.ge.s32.totalorder %s735_s18, 1  ;;  %s735_s18 = sphi %s767_s18, %s15_s18  }
   0x2   : > { %p187_p1 = scmp.lt.s32.totalorder %s735_s18, 3 }
   0x4   : > { %p188_p2 = pnand %p584_p0, %p187_p1 }
   0x5   : > { %v228_v0 = vld [vmem:[%s1190_s1 + $0x8] sm:$0xff] (!%p188_p2)  ;;  %v230_v1 = vld [vmem:[%s1190_s1 + $0x18] sm:$0xff] (!%p188_p2)  ;;  %v227_v2 = vld [vmem:[%s1190_s1] sm:$0xff] (!%p188_p2)  ;;  %p215_p3 = scmp.lt.s32.totalorder (!%p188_p2), %s580_s19, 1 }
   0x6   : > { %191 = sbr.rel (%p188_p2) target bundleno = 506 (0x1fa), region = 40  ;;  %v593_v3 = vpack.c.bf16 (!%p188_p2), %v230_v1, %v228_v0  ;;  %v229_v4 = vld [vmem:[%s1190_s1 + $0x10] sm:$0xff] (!%p188_p2)  ;;  %v232_v5 = vld [vmem:[%s1190_s1 + $0x28] sm:$0xff] (!%p188_p2)  ;;  %v234_v6 = vld [vmem:[%s1190_s1 + $0x38] sm:$0xff] (!%p188_p2) }
   0x7   : > { %v595_v7 = vpack.c.bf16 (!%p188_p2), %v229_v4, %v227_v2  ;;  %v597_v8 = vpack.c.bf16 (!%p188_p2), %v234_v6, %v232_v5  ;;  %v231_v9 = vld [vmem:[%s1190_s1 + $0x20] sm:$0xff] (!%p188_p2)  ;;  %v233_v10 = vld [vmem:[%s1190_s1 + $0x30] sm:$0xff] (!%p188_p2)  ;;  %v236_v11 = vld [vmem:[%s1190_s1 + $0x48] sm:$0xff] (!%p188_p2) }
   0x8   : > { %594 = vmatprep.subr.bf16.mxu0 (!%p188_p2), %v593_v3  ;;  %v238_v12 = vld [vmem:[%s1190_s1 + $0x58] sm:$0xff] (!%p188_p2)  ;;  %v599_v13 = vpack.c.bf16 (!%p188_p2), %v233_v10, %v231_v9  ;;  %v235_v15 = vld [vmem:[%s1190_s1 + $0x40] sm:$0xff] (!%p188_p2)  ;;  %v237_v16 = vld [vmem:[%s1190_s1 + $0x50] sm:$0xff] (!%p188_p2) }
   0x9   : > { %596 = vmatpush1.bf16.msra.mxu0 (!%p188_p2), %v595_v7  ;;  %v601_v14 = vpack.c.bf16 (!%p188_p2), %v238_v12, %v236_v11  ;;  %v240_v17 = vld [vmem:[%s1190_s1 + $0x68] sm:$0xff] (!%p188_p2)  ;;  %v242_v18 = vld [vmem:[%s1190_s1 + $0x78] sm:$0xff] (!%p188_p2)  ;;  %v603_v19 = vpack.c.bf16 (!%p188_p2), %v237_v16, %v235_v15  ;;  %v239_v21 = vld [vmem:[%s1190_s1 + $0x60] sm:$0xff] (!%p188_p2) }
   0xa   : > { %598 = vmatprep.subr.bf16.mxu0 (!%p188_p2), %v597_v8  ;;  %v605_v20 = vpack.c.bf16 (!%p188_p2), %v242_v18, %v240_v17  ;;  %v241_v22 = vld [vmem:[%s1190_s1 + $0x70] sm:$0xff] (!%p188_p2)  ;;  %v244_v23 = vld [vmem:[%s1190_s1 + $0x88] sm:$0xff] (!%p188_p2)  ;;  %v246_v24 = vld [vmem:[%s1190_s1 + $0x98] sm:$0xff] (!%p188_p2) }
   0xb   : > { %v607_v25 = vpack.c.bf16 (!%p188_p2), %v241_v22, %v239_v21  ;;  %v609_v26 = vpack.c.bf16 (!%p188_p2), %v246_v24, %v244_v23  ;;  %v243_v27 = vld [vmem:[%s1190_s1 + $0x80] sm:$0xff] (!%p188_p2)  ;;  %v245_v28 = vld [vmem:[%s1190_s1 + $0x90] sm:$0xff] (!%p188_p2)  ;;  %v248_v29 = vld [vmem:[%s1190_s1 + $0xa8] sm:$0xff] (!%p188_p2) }
   0xc   : > { %v250_v30 = vld [vmem:[%s1190_s1 + $0xb8] sm:$0xff] (!%p188_p2)  ;;  %v611_v31 = vpack.c.bf16 (!%p188_p2), %v245_v28, %v243_v27  ;;  %v247_v33 = vld [vmem:[%s1190_s1 + $0xa0] sm:$0xff] (!%p188_p2)  ;;  %v249_v34 = vld [vmem:[%s1190_s1 + $0xb0] sm:$0xff] (!%p188_p2) }
   0xd   : > { %600 = vmatpush1.bf16.msra.mxu0 %v599_v13  ;;  %s1196_s19 = smov (!%p215_p3, %s580_s19), 1  ;;  %v613_v32 = vpack.c.bf16 %v250_v30, %v248_v29  ;;  %v252_v35 = vld [vmem:[%s1190_s1 + $0xc8] sm:$0xff]  ;;  %v254_v36 = vld [vmem:[%s1190_s1 + $0xd8] sm:$0xff]  ;;  %v615_v37 = vpack.c.bf16 %v249_v34, %v247_v33  ;;  %v251_v38 = vld [vmem:[%s1190_s1 + $0xc0] sm:$0xff] }
   0xe   : > { %602 = vmatprep.subr.bf16.mxu0 %v601_v14  ;;  %s591_s16 = sshll.u32 %s1196_s19, 4  ;;  %v253_v39 = vld [vmem:[%s1190_s1 + $0xd0] sm:$0xff]  ;;  %v617_v40 = vpack.c.bf16 %v254_v36, %v252_v35  ;;  %v256_v41 = vld [vmem:[%s1190_s1 + $0xe8] sm:$0xff]  ;;  %v258_v42 = vld [vmem:[%s1190_s1 + $0xf8] sm:$0xff] }
   0xf   : > { %s865_s29 = scalar_lea.vmem %s1189_s0, %s591_s16  ;;  %v377_v44 = vld [vmem:[%s1192_s3 + $0x8] sm:$0xff]  ;;  %v379_v45 = vld [vmem:[%s1192_s3 + $0x18] sm:$0xff]  ;;  %v376_v46 = vld [vmem:[%s1192_s3] sm:$0xff]  ;;  %v619_v51 = vpack.c.bf16 %v253_v39, %v251_v38  ;;  %v621_v57 = vpack.c.bf16 %v258_v42, %v256_v41  ;;  %s224_s27 = scalar_lea.vmem %s1194_s5, %s591_s16 }
  0x10   : > { %v226_v43 = vld [vmem:[%s865_s29 + $0x8] sm:$0xff]  ;;  %v657_v47 = vpack.c.bf16 %v379_v45, %v377_v44  ;;  %v378_v48 = vld [vmem:[%s1192_s3 + $0x10] sm:$0xff]  ;;  %v383_v50 = vld [vmem:[%s1192_s3 + $0x38] sm:$0xff] }
  0x11   : > { %604 = vmatpush1.bf16.msra.mxu0 %v603_v19  ;;  %367 = vmatprep.mubr.f32.mxu0 %v226_v43  ;;  %v381_v49 = vld [vmem:[%s1192_s3 + $0x28] sm:$0xff]  ;;  %v659_v52 = vpack.c.bf16 %v378_v48, %v376_v46  ;;  %v380_v54 = vld [vmem:[%s1192_s3 + $0x20] sm:$0xff]  ;;  %v382_v55 = vld [vmem:[%s1192_s3 + $0x30] sm:$0xff] }
  0x12   : > { %606 = vmatprep.subr.bf16.mxu0 %v605_v20  ;;  %v661_v53 = vpack.c.bf16 %v383_v50, %v381_v49  ;;  %v385_v56 = vld [vmem:[%s1192_s3 + $0x48] sm:$0xff]  ;;  %v255_v58 = vld [vmem:[%s1190_s1 + $0xe0] sm:$0xff]  ;;  %v257_v59 = vld [vmem:[%s1190_s1 + $0xf0] sm:$0xff]  ;;  %658 = vmatprep.subr.bf16.mxu1 %v657_v47  ;;  %v663_v63 = vpack.c.bf16 %v382_v55, %v380_v54 }
  0x13   : > { %v387_v60 = vld [vmem:[%s1192_s3 + $0x58] sm:$0xff]  ;;  %v260_v61 = vld [vmem:[%s1190_s1 + $0x108] sm:$0xff]  ;;  %660 = vmatpush1.bf16.msra.mxu1 %v659_v52  ;;  %v384_v1 = vld [vmem:[%s1192_s3 + $0x40] sm:$0xff]  ;;  %v623_v3 = vpack.c.bf16 %v257_v59, %v255_v58 }
  0x14   : > { %v262_v62 = vld [vmem:[%s1190_s1 + $0x118] sm:$0xff]  ;;  %662 = vmatprep.subr.bf16.mxu1 %v661_v53  ;;  %v665_v0 = vpack.c.bf16 %v387_v60, %v385_v56  ;;  %v386_v2 = vld [vmem:[%s1192_s3 + $0x50] sm:$0xff]  ;;  %v389_v4 = vld [vmem:[%s1192_s3 + $0x68] sm:$0xff] }
  0x15   : > { %608 = vmatpush1.bf16.msra.mxu0 %v607_v25  ;;  %v391_v5 = vld [vmem:[%s1192_s3 + $0x78] sm:$0xff]  ;;  %v625_v6 = vpack.c.bf16 %v262_v62, %v260_v61  ;;  %v259_v7 = vld [vmem:[%s1190_s1 + $0x100] sm:$0xff]  ;;  %v261_v8 = vld [vmem:[%s1190_s1 + $0x110] sm:$0xff]  ;;  %v667_v11 = vpack.c.bf16 %v386_v2, %v384_v1 }
  0x16   : > { %610 = vmatprep.subr.bf16.mxu0 %v609_v26  ;;  %v264_v9 = vld [vmem:[%s1190_s1 + $0x128] sm:$0xff]  ;;  %v266_v10 = vld [vmem:[%s1190_s1 + $0x138] sm:$0xff]  ;;  %v669_v12 = vpack.c.bf16 %v391_v5, %v389_v4  ;;  %v388_v13 = vld [vmem:[%s1192_s3 + $0x60] sm:$0xff]  ;;  %v627_v15 = vpack.c.bf16 %v261_v8, %v259_v7 }
  0x17   : > { %664 = vmatpush1.bf16.msra.mxu1 %v663_v63  ;;  %v390_v14 = vld [vmem:[%s1192_s3 + $0x70] sm:$0xff]  ;;  %v393_v16 = vld [vmem:[%s1192_s3 + $0x88] sm:$0xff]  ;;  %v395_v17 = vld [vmem:[%s1192_s3 + $0x98] sm:$0xff]  ;;  %v629_v18 = vpack.c.bf16 %v266_v10, %v264_v9 }
  0x18   : > { %666 = vmatprep.subr.bf16.mxu1 %v665_v0  ;;  %v263_v19 = vld [vmem:[%s1190_s1 + $0x120] sm:$0xff]  ;;  %v265_v20 = vld [vmem:[%s1190_s1 + $0x130] sm:$0xff]  ;;  %v268_v21 = vld [vmem:[%s1190_s1 + $0x148] sm:$0xff]  ;;  %v671_v23 = vpack.c.bf16 %v390_v14, %v388_v13  ;;  %v673_v24 = vpack.c.bf16 %v395_v17, %v393_v16 }
  0x19   : > { %612 = vmatpush1.bf16.msra.mxu0 %v611_v31  ;;  %v270_v22 = vld [vmem:[%s1190_s1 + $0x158] sm:$0xff]  ;;  %v392_v25 = vld [vmem:[%s1192_s3 + $0x80] sm:$0xff]  ;;  %v394_v26 = vld [vmem:[%s1192_s3 + $0x90] sm:$0xff]  ;;  %v631_v27 = vpack.c.bf16 %v265_v20, %v263_v19 }
  0x1a   : > { %614 = vmatprep.subr.bf16.mxu0 %v613_v32  ;;  %v397_v28 = vld [vmem:[%s1192_s3 + $0xa8] sm:$0xff]  ;;  %v399_v29 = vld [vmem:[%s1192_s3 + $0xb8] sm:$0xff]  ;;  %v633_v30 = vpack.c.bf16 %v270_v22, %v268_v21  ;;  %v267_v31 = vld [vmem:[%s1190_s1 + $0x140] sm:$0xff]  ;;  %v675_v35 = vpack.c.bf16 %v394_v26, %v392_v25 }
  0x1b   : > { %668 = vmatpush1.bf16.msra.mxu1 %v667_v11  ;;  %v269_v32 = vld [vmem:[%s1190_s1 + $0x150] sm:$0xff]  ;;  %v272_v33 = vld [vmem:[%s1190_s1 + $0x168] sm:$0xff]  ;;  %v274_v34 = vld [vmem:[%s1190_s1 + $0x178] sm:$0xff]  ;;  %v677_v36 = vpack.c.bf16 %v399_v29, %v397_v28 }
  0x1c   : > { %670 = vmatprep.subr.bf16.mxu1 %v669_v12  ;;  %v398_v38 = vld [vmem:[%s1192_s3 + $0xb0] sm:$0xff]  ;;  %v635_v39 = vpack.c.bf16 %v269_v32, %v267_v31  ;;  %v403_v41 = vld [vmem:[%s1192_s3 + $0xd8] sm:$0xff]  ;;  %v637_v42 = vpack.c.bf16 %v274_v34, %v272_v33  ;;  %v271_v43 = vld [vmem:[%s1190_s1 + $0x160] sm:$0xff] }
  0x1d   : > { %616 = vmatpush1.bf16.msra.mxu0 %v615_v37  ;;  %v396_v37 = vld [vmem:[%s1192_s3 + $0xa0] sm:$0xff]  ;;  %v273_v44 = vld [vmem:[%s1190_s1 + $0x170] sm:$0xff]  ;;  %v276_v45 = vld [vmem:[%s1190_s1 + $0x188] sm:$0xff] }
  0x1e   : > { %618 = vmatprep.subr.bf16.mxu0 %v617_v40  ;;  %v401_v40 = vld [vmem:[%s1192_s3 + $0xc8] sm:$0xff]  ;;  %v278_v46 = vld [vmem:[%s1190_s1 + $0x198] sm:$0xff]  ;;  %v679_v47 = vpack.c.bf16 %v398_v38, %v396_v37  ;;  %v400_v49 = vld [vmem:[%s1192_s3 + $0xc0] sm:$0xff] }
  0x1f   : > { %672 = vmatpush1.bf16.msra.mxu1 %v671_v23  ;;  %v681_v48 = vpack.c.bf16 %v403_v41, %v401_v40  ;;  %v402_v50 = vld [vmem:[%s1192_s3 + $0xd0] sm:$0xff]  ;;  %v405_v52 = vld [vmem:[%s1192_s3 + $0xe8] sm:$0xff]  ;;  %v407_v53 = vld [vmem:[%s1192_s3 + $0xf8] sm:$0xff]  ;;  %v641_v54 = vpack.c.bf16 %v278_v46, %v276_v45 }
  0x20   : > { %674 = vmatprep.subr.bf16.mxu1 %v673_v24  ;;  %v275_v55 = vld [vmem:[%s1190_s1 + $0x180] sm:$0xff]  ;;  %v277_v56 = vld [vmem:[%s1190_s1 + $0x190] sm:$0xff]  ;;  %v282_v58 = vld [vmem:[%s1190_s1 + $0x1b8] sm:$0xff]  ;;  %v683_v59 = vpack.c.bf16 %v402_v50, %v400_v49  ;;  %v685_v60 = vpack.c.bf16 %v407_v53, %v405_v52 }
  0x21   : > { %620 = vmatpush1.bf16.msra.mxu0 %v619_v51  ;;  %v639_v51 = vpack.c.bf16 %v273_v44, %v271_v43  ;;  %v404_v61 = vld [vmem:[%s1192_s3 + $0xe0] sm:$0xff]  ;;  %v406_v62 = vld [vmem:[%s1192_s3 + $0xf0] sm:$0xff]  ;;  %v643_v63 = vpack.c.bf16 %v277_v56, %v275_v55  ;;  %v409_v0 = vld [vmem:[%s1192_s3 + $0x108] sm:$0xff] }
  0x22   : > { %622 = vmatprep.subr.bf16.mxu0 %v621_v57  ;;  %v280_v57 = vld [vmem:[%s1190_s1 + $0x1a8] sm:$0xff]  ;;  %v411_v1 = vld [vmem:[%s1192_s3 + $0x118] sm:$0xff]  ;;  %v281_v4 = vld [vmem:[%s1190_s1 + $0x1b0] sm:$0xff]  ;;  %v687_v7 = vpack.c.bf16 %v406_v62, %v404_v61 }
  0x23   : > { %676 = vmatpush1.bf16.msra.mxu1 %v675_v35  ;;  %v645_v2 = vpack.c.bf16 %v282_v58, %v280_v57  ;;  %v284_v5 = vld [vmem:[%s1190_s1 + $0x1c8] sm:$0xff]  ;;  %v689_v8 = vpack.c.bf16 %v411_v1, %v409_v0  ;;  %v408_v9 = vld [vmem:[%s1192_s3 + $0x100] sm:$0xff]  ;;  %v410_v10 = vld [vmem:[%s1192_s3 + $0x110] sm:$0xff] }
  0x24   : > { %678 = vmatprep.subr.bf16.mxu1 %v677_v36  ;;  %v413_v12 = vld [vmem:[%s1192_s3 + $0x128] sm:$0xff]  ;;  %v415_v13 = vld [vmem:[%s1192_s3 + $0x138] sm:$0xff]  ;;  %v285_v16 = vld [vmem:[%s1190_s1 + $0x1d0] sm:$0xff]  ;;  %v691_v19 = vpack.c.bf16 %v410_v10, %v408_v9 }
  0x25   : > { %624 = vmatpush1.bf16.msra.mxu0 %v623_v3  ;;  %v279_v3 = vld [vmem:[%s1190_s1 + $0x1a0] sm:$0xff]  ;;  %v288_v17 = vld [vmem:[%s1190_s1 + $0x1e8] sm:$0xff]  ;;  %v693_v20 = vpack.c.bf16 %v415_v13, %v413_v12  ;;  %v414_v22 = vld [vmem:[%s1192_s3 + $0x130] sm:$0xff] }
  0x26   : > { %626 = vmatprep.subr.bf16.mxu0 %v625_v6  ;;  %v286_v6 = vld [vmem:[%s1190_s1 + $0x1d8] sm:$0xff]  ;;  %v647_v11 = vpack.c.bf16 %v281_v4, %v279_v3  ;;  %v412_v21 = vld [vmem:[%s1192_s3 + $0x120] sm:$0xff]  ;;  %v417_v24 = vld [vmem:[%s1192_s3 + $0x148] sm:$0xff] }
  0x27   : > { %680 = vmatpush1.bf16.msra.mxu1 %v679_v47  ;;  %v649_v14 = vpack.c.bf16 %v286_v6, %v284_v5  ;;  %v419_v25 = vld [vmem:[%s1192_s3 + $0x158] sm:$0xff]  ;;  %v289_v28 = vld [vmem:[%s1190_s1 + $0x1f0] sm:$0xff]  ;;  %v695_v29 = vpack.c.bf16 %v414_v22, %v412_v21  ;;  %v416_v31 = vld [vmem:[%s1192_s3 + $0x140] sm:$0xff] }
  0x28   : > { %682 = vmatprep.subr.bf16.mxu1 %v681_v48  ;;  %v418_v32 = vld [vmem:[%s1192_s3 + $0x150] sm:$0xff]  ;;  %v421_v34 = vld [vmem:[%s1192_s3 + $0x168] sm:$0xff]  ;;  %v423_v35 = vld [vmem:[%s1192_s3 + $0x178] sm:$0xff] }
  0x29   : > { %628 = vmatpush1.bf16.msra.mxu0 %v627_v15  ;;  %v283_v15 = vld [vmem:[%s1190_s1 + $0x1c0] sm:$0xff]  ;;  %v699_v36 = vpack.c.bf16 %v418_v32, %v416_v31  ;;  %v701_v37 = vpack.c.bf16 %v423_v35, %v421_v34  ;;  %v425_v41 = vld [vmem:[%s1192_s3 + $0x188] sm:$0xff]  ;;  %v426_v46 = vld [vmem:[%s1192_s3 + $0x190] sm:$0xff] }
  0x2a   : > { %630 = vmatprep.subr.bf16.mxu0 %v629_v18  ;;  %v290_v18 = vld [vmem:[%s1190_s1 + $0x1f8] sm:$0xff]  ;;  %v651_v23 = vpack.c.bf16 %v285_v16, %v283_v15  ;;  %v420_v38 = vld [vmem:[%s1192_s3 + $0x160] sm:$0xff]  ;;  %v429_v47 = vld [vmem:[%s1192_s3 + $0x1a8] sm:$0xff] }
  0x2b   : > { %684 = vmatpush1.bf16.msra.mxu1 %v683_v59  ;;  %v653_v26 = vpack.c.bf16 %v290_v18, %v288_v17  ;;  %v225_v40 = vld [vmem:[%s865_s29] sm:$0xff]  ;;  %v431_v48 = vld [vmem:[%s1192_s3 + $0x1b8] sm:$0xff]  ;;  %v430_v52 = vld [vmem:[%s1192_s3 + $0x1b0] sm:$0xff] }
  0x2c   : > { %686 = vmatprep.subr.bf16.mxu1 %v685_v60  ;;  %v424_v45 = vld [vmem:[%s1192_s3 + $0x180] sm:$0xff]  ;;  %v709_v50 = vpack.c.bf16 %v431_v48, %v429_v47  ;;  %v433_v53 = vld [vmem:[%s1192_s3 + $0x1c8] sm:$0xff]  ;;  %v434_v58 = vld [vmem:[%s1192_s3 + $0x1d0] sm:$0xff] }
  0x2d   : > { %632 = vmatpush1.bf16.msra.mxu0 %v631_v27  ;;  %v287_v27 = vld [vmem:[%s1190_s1 + $0x1e0] sm:$0xff]  ;;  %v707_v49 = vpack.c.bf16 %v426_v46, %v424_v45  ;;  %v437_v60 = vld [vmem:[%s1192_s3 + $0x1e8] sm:$0xff]  ;;  %v439_v61 = vld [vmem:[%s1192_s3 + $0x1f8] sm:$0xff] }
  0x2e   : > { %634 = vmatprep.subr.bf16.mxu0 %v633_v30  ;;  %v697_v30 = vpack.c.bf16 %v419_v25, %v417_v24  ;;  %v655_v33 = vpack.c.bf16 %v289_v28, %v287_v27  ;;  %v432_v57 = vld [vmem:[%s1192_s3 + $0x1c0] sm:$0xff]  ;;  %v717_v62 = vpack.c.bf16 %v439_v61, %v437_v60  ;;  %v438_v0 = vld [vmem:[%s1192_s3 + $0x1f0] sm:$0xff] }
  0x2f   : > { %688 = vmatpush1.bf16.msra.mxu1 %v687_v7  ;;  %v715_v59 = vpack.c.bf16 %v434_v58, %v432_v57  ;;  %v291_v5 = vld [vmem:[%s1191_s2] sm:$0x3] }
  0x30   : > { %690 = vmatprep.subr.bf16.mxu1 %v689_v8  ;;  %v440_v15 = vld [vmem:[%s1193_s4] sm:$0x3] }
  0x31   : > { %636 = vmatpush1.bf16.msra.mxu0 %v635_v39  ;;  %v422_v39 = vld [vmem:[%s1192_s3 + $0x170] sm:$0xff] }
  0x32   : > { %638 = vmatprep.subr.bf16.mxu0 %v637_v42  ;;  %v427_v42 = vld [vmem:[%s1192_s3 + $0x198] sm:$0xff]  ;;  %v703_v43 = vpack.c.bf16 %v422_v39, %v420_v38 }
  0x33   : > { %692 = vmatpush1.bf16.msra.mxu1 %v691_v19  ;;  %v705_v44 = vpack.c.bf16 %v427_v42, %v425_v41 }
  0x34   : > { %694 = vmatprep.subr.bf16.mxu1 %v693_v20 }
  0x35   : > { %640 = vmatpush1.bf16.msra.mxu0 %v639_v51  ;;  %v428_v51 = vld [vmem:[%s1192_s3 + $0x1a0] sm:$0xff] }
  0x36   : > { %642 = vmatprep.subr.bf16.mxu0 %v641_v54  ;;  %v435_v54 = vld [vmem:[%s1192_s3 + $0x1d8] sm:$0xff]  ;;  %v711_v55 = vpack.c.bf16 %v430_v52, %v428_v51 }
  0x37   : > { %696 = vmatpush1.bf16.msra.mxu1 %v695_v29  ;;  %v713_v56 = vpack.c.bf16 %v435_v54, %v433_v53 }
  0x38   : > { %698 = vmatprep.subr.bf16.mxu1 %v697_v30 }
  0x39   : > { %644 = vmatpush1.bf16.msra.mxu0 %v643_v63  ;;  %v436_v63 = vld [vmem:[%s1192_s3 + $0x1e0] sm:$0xff] }
  0x3a   : > { %646 = vmatprep.subr.bf16.mxu0 %v645_v2  ;;  %v719_v1 = vpack.c.bf16 %v438_v0, %v436_v63  ;;  %v293_v2 = vlaneseq }
  0x3b   : > { %700 = vmatpush1.bf16.msra.mxu1 %v699_v36 }
  0x3c   : > { %702 = vmatprep.subr.bf16.mxu1 %v701_v37  ;;  %v294_v3 = vshrl.u32 %v293_v2, 7 }
  0x3d   : > { %648 = vmatpush1.bf16.msra.mxu0 %v647_v11 }
  0x3e   : > { %650 = vmatprep.subr.bf16.mxu0 %v649_v14  ;;  %v295_v4 = vsub.s32 0, %v294_v3  ;;  %v299_v6 = vsub.s32 1, %v294_v3 }
  0x3f   : > { %704 = vmatpush1.bf16.msra.mxu1 %v703_v43 }
  0x40   : > { %706 = vmatprep.subr.bf16.mxu1 %v705_v44  ;;  %v296_v7 = vrot.slane %v291_v5, %v295_v4  ;;  %v300_v8 = vrot.slane %v291_v5, %v299_v6  ;;  %v445_v16 = vrot.slane %v440_v15, %v295_v4  ;;  %v449_v17 = vrot.slane %v440_v15, %v299_v6 }
  0x41   : > { %652 = vmatpush1.bf16.msra.mxu0 %v651_v23 }
  0x42   : > { %654 = vmatprep.subr.bf16.mxu0 %v653_v26 }
  0x43   : > { %708 = vmatpush1.bf16.msra.mxu1 %v707_v49 }
  0x44   : > { %710 = vmatprep.subr.bf16.mxu1 %v709_v50 }
  0x45   : > { %656 = vmatpush1.bf16.msra.mxu0 %v655_v33 }
  0x47   : > { %712 = vmatpush1.bf16.msra.mxu1 %v711_v55 }
  0x48   : > { %368 = vmatmul.mubr.f32.vlgmr.msra.gmra.mrb[0].mxu0 %v225_v40  ;;  %714 = vmatprep.subr.bf16.mxu1 %v713_v56 }
  0x4b   : > { %716 = vmatpush1.bf16.msra.mxu1 %v715_v59 }
  0x4c   : > { %718 = vmatprep.subr.bf16.mxu1 %v717_v62 }
  0x4f   : > { %720 = vmatpush1.bf16.msra.mxu1 %v719_v1 }
 0x11b   : > { %v369_v9 = vpop.f32.mrb[0].mxu0 }
 0x11c   : > { %v370_v10 = vadd.f32 %v369_v9, %v296_v7  ;;  %v371_v11 = vpop.f32.mrb[1].mxu0 }
 0x11d   : > { %v372_v12 = vadd.f32 %v371_v11, %v300_v8 }
 0x11e   : > { %v374_v14 = vmax.f32 %v370_v10, 0.0 }
 0x11f   : > { %v375_v13 = vmax.f32 %v372_v12, 0.0 }
 0x121   : > { %516 = vmatprep.mubr.f32.mxu1 %v375_v13 }
 0x122   : > { %517 = vmatmul.mubr.f32.vlgmr.msra.gmra.mrb[0].mxu1 %v374_v14 }
 0x1f5   : > { %v518_v18 = vpop.f32.mrb[0].mxu1 }
 0x1f6   : > { %v519_v19 = vadd.f32 %v518_v18, %v445_v16  ;;  %v520_v20 = vpop.f32.mrb[1].mxu1 }
 0x1f7   : > { %v521_v21 = vadd.f32 %v520_v20, %v449_v17 }
 0x1f8   : > { %523 = vst [vmem:[%s224_s27] sm:$0xff] %v519_v19 }
 0x1f9   : > { %524 = vst [vmem:[%s224_s27 + $0x8] sm:$0xff] %v521_v21 }
 0x1fa PF: > { %s15_s18 = sadd.s32 1, %s735_s18  }
 0x1fb   : > { %p12_p4 = scmp.ge.s32.totalorder %s15_s18, 4  }
 0x1fd   :  { %14 = sbr.rel (!%p12_p4) target bundleno = 1 (0x1), region = 70 }

</bundles_post_ra>
